<compile_context>
chip_gen: v6e
topology: v6e:2x2x1
jax: 0.10.0
libtpu: 0.0.40
codegen_flags: <defaults>
</compile_context>

<pallas_src>
import functools

import jax
import jax.numpy as jnp
from jax.experimental import pallas as pl
from jax.experimental.pallas import tpu as pltpu


def _resblock_kernel(x_ref, a_ref, w_ref, b_ref, s_ref, o_ref,
                     pad_ref, taps_ref, *, C, H, W, PAD):
    HW = H * W

    # Zero the halo scratch once per batch element; each conv only rewrites
    # the interior, so the pad regions stay zero (PReLU(0) = 0, hence zero
    # padding commutes with the activation).
    pad_ref[...] = jnp.zeros(pad_ref.shape, pad_ref.dtype)

    # Column-within-row index for every flat spatial lane; used to mask the
    # horizontal taps that would otherwise wrap across image rows.
    col = jax.lax.broadcasted_iota(jnp.int32, (C, HW), 1)
    if W & (W - 1) == 0:
        col = jnp.bitwise_and(col, W - 1)
    else:
        col = col % W
    not_left = col != 0            # valid source lanes for dx = -1 taps
    not_right = col != (W - 1)     # valid source lanes for dx = +1 taps

    def prelu(v, i):
        a = a_ref[i]                               # (C, 1) per-channel slope
        return jnp.where(v > 0, v, v * a)

    def conv3x3(v, i):
        # 3x3 "same" conv (zero pad) + bias for stage i; v is (C, HW) f32.
        pad_ref[:, PAD:PAD + HW] = v               # aligned interior store
        t = 0
        for dy in (-1, 0, 1):
            for dx in (-1, 0, 1):
                d = dy * W + dx
                tap = pad_ref[:, PAD + d:PAD + d + HW]
                if dx == -1:
                    tap = jnp.where(not_left, tap, 0.0)
                elif dx == 1:
                    tap = jnp.where(not_right, tap, 0.0)
                taps_ref[t * C:(t + 1) * C, :] = tap
                t += 1
        y = jnp.dot(w_ref[i], taps_ref[...],       # (C, 9C) @ (9C, HW)
                    preferred_element_type=jnp.float32)
        return y + b_ref[i]                        # bias (C, 1) broadcast

    x = x_ref[0].astype(jnp.float32)               # (C, HW)
    u = conv3x3(prelu(x, 0), 0)                    # conv1(relu1(x))
    g = conv3x3(prelu(u, 1), 1)                    # G_yn  = conv3(relu3(.))
    yn1 = g + x                                    # yn_1  = G_yn + yn
    u = conv3x3(prelu(yn1, 2), 2)                  # conv2(relu2(yn_1))
    h = conv3x3(prelu(u, 3), 3)                    # Gyn_1 = conv4(relu4(.))
    s = s_ref[0, 0]
    o_ref[0] = ((h + g) * s + x).astype(o_ref.dtype)


def res_block_forward(x_nchw, params):
    B, C, H, W = x_nchw.shape
    HW = H * W
    PAD = ((W + 1 + 127) // 128) * 128             # halo >= W+1, lane aligned

    def wmat(w_oihw):
        # (Cout, Cin, 3, 3) -> (Cout, 9*Cin); tap-major (ky, kx) then ci,
        # matching the tap stacking order inside the kernel.
        return jnp.transpose(w_oihw, (0, 2, 3, 1)).reshape(C, 9 * C)

    # Parameters stacked in usage order:
    # (relu1,conv1), (relu3,conv3), (relu2,conv2), (relu4,conv4).
    order = (("a1", "w1", "b1"), ("a3", "w3", "b3"),
             ("a2", "w2", "b2"), ("a4", "w4", "b4"))
    a_all = jnp.stack([params[a] for a, _, _ in order]).reshape(4, C, 1)
    w_all = jnp.stack([wmat(params[w]) for _, w, _ in order])       # (4,C,9C)
    b_all = jnp.stack([params[b] for _, _, b in order]).reshape(4, C, 1)
    scale = params["scale1"].reshape(1, 1).astype(jnp.float32)

    x_flat = x_nchw.reshape(B, C, HW)              # NCHW -> (B, C, H*W)
    kernel = functools.partial(_resblock_kernel, C=C, H=H, W=W, PAD=PAD)
    out_flat = pl.pallas_call(
        kernel,
        out_shape=jax.ShapeDtypeStruct((B, C, HW), x_nchw.dtype),
        grid=(B,),
        in_specs=[
            pl.BlockSpec((1, C, HW), lambda b: (b, 0, 0)),
            pl.BlockSpec((4, C, 1), lambda b: (0, 0, 0)),
            pl.BlockSpec((4, C, 9 * C), lambda b: (0, 0, 0)),
            pl.BlockSpec((4, C, 1), lambda b: (0, 0, 0)),
            pl.BlockSpec(memory_space=pltpu.MemorySpace.SMEM),
        ],
        out_specs=pl.BlockSpec((1, C, HW), lambda b: (b, 0, 0)),
        scratch_shapes=[
            pltpu.VMEM((C, HW + 2 * PAD), jnp.float32),   # zero-padded rows
            pltpu.VMEM((9 * C, HW), jnp.float32),         # im2col tap stack
        ],
        compiler_params=pltpu.CompilerParams(
            dimension_semantics=("parallel",)),
    )(x_flat, a_all, w_all, b_all, scale)
    return out_flat.reshape(B, C, H, W)


# ----------------------------------------------------------------------------
# Pure-JAX reference (same math) for a correctness check.
# ----------------------------------------------------------------------------
def _res_block_ref(x, p):
    def stage(v, a, w, b):
        va = jnp.where(v > 0, v, v * a[None, :, None, None])
        y = jax.lax.conv_general_dilated(
            va, w, window_strides=(1, 1), padding="SAME",
            dimension_numbers=("NCHW", "OIHW", "NCHW"))
        return y + b[None, :, None, None]

    g = stage(stage(x, p["a1"], p["w1"], p["b1"]), p["a3"], p["w3"], p["b3"])
    yn1 = g + x
    h = stage(stage(yn1, p["a2"], p["w2"], p["b2"]), p["a4"], p["w4"], p["b4"])
    return (h + g) * p["scale1"][0] + x


if __name__ == "__main__":
    B, C, H, W = 2, 8, 16, 16          # n_feats = 8, kernel_size = 3
    key = jax.random.PRNGKey(0)
    kx, k1, k2, k3, k4, kb1, kb2, kb3, kb4 = jax.random.split(key, 9)

    params = {
        # PyTorch Conv2d weight layout: (Cout, Cin, kH, kW)
        "w1": 0.1 * jax.random.normal(k1, (C, C, 3, 3), jnp.float32),
        "w2": 0.1 * jax.random.normal(k2, (C, C, 3, 3), jnp.float32),
        "w3": 0.1 * jax.random.normal(k3, (C, C, 3, 3), jnp.float32),
        "w4": 0.1 * jax.random.normal(k4, (C, C, 3, 3), jnp.float32),
        "b1": 0.1 * jax.random.normal(kb1, (C,), jnp.float32),
        "b2": 0.1 * jax.random.normal(kb2, (C,), jnp.float32),
        "b3": 0.1 * jax.random.normal(kb3, (C,), jnp.float32),
        "b4": 0.1 * jax.random.normal(kb4, (C,), jnp.float32),
        "a1": jnp.full((C,), 0.25, jnp.float32),   # nn.PReLU(n_feats, 0.25)
        "a2": jnp.full((C,), 0.25, jnp.float32),
        "a3": jnp.full((C,), 0.25, jnp.float32),
        "a4": jnp.full((C,), 0.25, jnp.float32),
        "scale1": jnp.array([0.5], jnp.float32),   # nn.Parameter([0.5])
    }

    # Input in PyTorch NCHW convention (no transpose needed by the kernel).
    x = jax.random.normal(kx, (B, C, H, W), jnp.float32)

    fwd = jax.jit(res_block_forward)
    out = jax.block_until_ready(fwd(x, params))

    ref = _res_block_ref(x, params)
    assert out.shape == (B, C, H, W)
    max_err = float(jnp.max(jnp.abs(out - ref)))
    assert jnp.allclose(out, ref, atol=1e-4, rtol=1e-4), max_err

    print("KERNEL_OK")
</pallas_src>

<mosaic_0001>
module attributes {stable_mosaic.version = 11 : i64} {
  func.func @_resblock_kernel(%arg0: i32, %arg1: memref<1x8x256xf32, #tpu.memory_space<vmem>>, %arg2: memref<4x8x1xf32, #tpu.memory_space<vmem>>, %arg3: memref<4x8x72xf32, #tpu.memory_space<vmem>>, %arg4: memref<4x8x1xf32, #tpu.memory_space<vmem>>, %arg5: memref<1x1xf32, #tpu.memory_space<smem>>, %arg6: memref<1x8x256xf32, #tpu.memory_space<vmem>>, %arg7: memref<8x512xf32, #tpu.memory_space<vmem>>, %arg8: memref<72x256xf32, #tpu.memory_space<vmem>>) attributes {dimension_semantics = [#tpu.dimension_semantics<parallel>], iteration_bounds = array<i64: 2>, scalar_prefetch = 0 : i64, scratch_operands = 2 : i64, tpu.core_type = #tpu.core_type<tc>, window_params = [{transform_indices = @transform_0, window_bounds = array<i64: 1, 8, 256>}, {pipeline_mode = #tpu.pipeline_mode<synchronous>, transform_indices = @transform_1, window_bounds = array<i64: 4, 8, 1>}, {pipeline_mode = #tpu.pipeline_mode<synchronous>, transform_indices = @transform_2, window_bounds = array<i64: 4, 8, 72>}, {pipeline_mode = #tpu.pipeline_mode<synchronous>, transform_indices = @transform_3, window_bounds = array<i64: 4, 8, 1>}, {transform_indices = @transform_4, window_bounds = array<i64: 1, 1>}, {transform_indices = @transform_5, window_bounds = array<i64: 1, 8, 256>}]} {
    %cst = arith.constant 0.000000e+00 : f32
    %0 = vector.broadcast %cst : f32 to vector<8x512xf32>
    %c0 = arith.constant 0 : index
    %c0_0 = arith.constant 0 : index
    %1 = vector.load %arg7[%c0, %c0_0] : memref<8x512xf32, #tpu.memory_space<vmem>>, vector<8x512xf32>
    tpu.vector_store %arg7[%c0, %c0_0], %0 {strides = array<i32>} : memref<8x512xf32, #tpu.memory_space<vmem>>, vector<8x512xf32>,
    %2 = tpu.iota {dimensions = array<i32: 1>} : vector<8x256xi32>
    %c15_i32 = arith.constant 15 : i32
    %3 = vector.broadcast %c15_i32 : i32 to vector<8x256xi32>
    %4 = arith.andi %2, %3 : vector<8x256xi32>
    %c0_i32 = arith.constant 0 : i32
    %5 = vector.broadcast %c0_i32 : i32 to vector<8x256xi32>
    %6 = arith.cmpi ne, %4, %5 : vector<8x256xi32>
    %c15_i32_1 = arith.constant 15 : i32
    %7 = vector.broadcast %c15_i32_1 : i32 to vector<8x256xi32>
    %8 = arith.cmpi ne, %4, %7 : vector<8x256xi32>
    %c0_2 = arith.constant 0 : index
    %c0_3 = arith.constant 0 : index
    %c0_4 = arith.constant 0 : index
    %9 = vector.load %arg1[%c0_2, %c0_3, %c0_4] : memref<1x8x256xf32, #tpu.memory_space<vmem>>, vector<1x8x256xf32>
    %10 = vector.shape_cast %9 : vector<1x8x256xf32> to vector<8x256xf32>
    %c0_5 = arith.constant 0 : index
    %c0_6 = arith.constant 0 : index
    %c0_7 = arith.constant 0 : index
    %11 = vector.load %arg2[%c0_5, %c0_6, %c0_7] : memref<4x8x1xf32, #tpu.memory_space<vmem>>, vector<1x8x1xf32>
    %12 = vector.shape_cast %11 : vector<1x8x1xf32> to vector<8x1xf32>
    %cst_8 = arith.constant 0.000000e+00 : f32
    %13 = vector.broadcast %cst_8 : f32 to vector<8x256xf32>
    %14 = arith.cmpf ogt, %10, %13 : vector<8x256xf32>
    %15 = vector.broadcast %12 : vector<8x1xf32> to vector<8x256xf32>
    %16 = arith.mulf %10, %15 : vector<8x256xf32>
    %17 = arith.select %14, %10, %16 : vector<8x256xi1>, vector<8x256xf32>
    %c0_9 = arith.constant 0 : index
    %c128 = arith.constant 128 : index
    %18 = vector.load %arg7[%c0_9, %c128] : memref<8x512xf32, #tpu.memory_space<vmem>>, vector<8x256xf32>
    tpu.vector_store %arg7[%c0_9, %c128], %17 {strides = array<i32>} : memref<8x512xf32, #tpu.memory_space<vmem>>, vector<8x256xf32>,
    %c0_10 = arith.constant 0 : index
    %c111 = arith.constant 111 : index
    %19 = vector.load %arg7[%c0_10, %c111] : memref<8x512xf32, #tpu.memory_space<vmem>>, vector<8x256xf32>
    %cst_11 = arith.constant 0.000000e+00 : f32
    %20 = vector.broadcast %cst_11 : f32 to vector<8x256xf32>
    %21 = arith.select %6, %19, %20 : vector<8x256xi1>, vector<8x256xf32>
    %c0_12 = arith.constant 0 : index
    %c0_13 = arith.constant 0 : index
    %22 = vector.load %arg8[%c0_12, %c0_13] : memref<72x256xf32, #tpu.memory_space<vmem>>, vector<8x256xf32>
    tpu.vector_store %arg8[%c0_12, %c0_13], %21 {strides = array<i32>} : memref<72x256xf32, #tpu.memory_space<vmem>>, vector<8x256xf32>,
    %c0_14 = arith.constant 0 : index
    %c112 = arith.constant 112 : index
    %23 = vector.load %arg7[%c0_14, %c112] : memref<8x512xf32, #tpu.memory_space<vmem>>, vector<8x256xf32>
    %c8 = arith.constant 8 : index
    %c0_15 = arith.constant 0 : index
    %24 = vector.load %arg8[%c8, %c0_15] : memref<72x256xf32, #tpu.memory_space<vmem>>, vector<8x256xf32>
    tpu.vector_store %arg8[%c8, %c0_15], %23 {strides = array<i32>} : memref<72x256xf32, #tpu.memory_space<vmem>>, vector<8x256xf32>,
    %c0_16 = arith.constant 0 : index
    %c113 = arith.constant 113 : index
    %25 = vector.load %arg7[%c0_16, %c113] : memref<8x512xf32, #tpu.memory_space<vmem>>, vector<8x256xf32>
    %cst_17 = arith.constant 0.000000e+00 : f32
    %26 = vector.broadcast %cst_17 : f32 to vector<8x256xf32>
    %27 = arith.select %8, %25, %26 : vector<8x256xi1>, vector<8x256xf32>
    %c16 = arith.constant 16 : index
    %c0_18 = arith.constant 0 : index
    %28 = vector.load %arg8[%c16, %c0_18] : memref<72x256xf32, #tpu.memory_space<vmem>>, vector<8x256xf32>
    tpu.vector_store %arg8[%c16, %c0_18], %27 {strides = array<i32>} : memref<72x256xf32, #tpu.memory_space<vmem>>, vector<8x256xf32>,
    %c0_19 = arith.constant 0 : index
    %c127 = arith.constant 127 : index
    %29 = vector.load %arg7[%c0_19, %c127] : memref<8x512xf32, #tpu.memory_space<vmem>>, vector<8x256xf32>
    %cst_20 = arith.constant 0.000000e+00 : f32
    %30 = vector.broadcast %cst_20 : f32 to vector<8x256xf32>
    %31 = arith.select %6, %29, %30 : vector<8x256xi1>, vector<8x256xf32>
    %c24 = arith.constant 24 : index
    %c0_21 = arith.constant 0 : index
    %32 = vector.load %arg8[%c24, %c0_21] : memref<72x256xf32, #tpu.memory_space<vmem>>, vector<8x256xf32>
    tpu.vector_store %arg8[%c24, %c0_21], %31 {strides = array<i32>} : memref<72x256xf32, #tpu.memory_space<vmem>>, vector<8x256xf32>,
    %c0_22 = arith.constant 0 : index
    %c128_23 = arith.constant 128 : index
    %33 = vector.load %arg7[%c0_22, %c128_23] : memref<8x512xf32, #tpu.memory_space<vmem>>, vector<8x256xf32>
    %c32 = arith.constant 32 : index
    %c0_24 = arith.constant 0 : index
    %34 = vector.load %arg8[%c32, %c0_24] : memref<72x256xf32, #tpu.memory_space<vmem>>, vector<8x256xf32>
    tpu.vector_store %arg8[%c32, %c0_24], %33 {strides = array<i32>} : memref<72x256xf32, #tpu.memory_space<vmem>>, vector<8x256xf32>,
    %c0_25 = arith.constant 0 : index
    %c129 = arith.constant 129 : index
    %35 = vector.load %arg7[%c0_25, %c129] : memref<8x512xf32, #tpu.memory_space<vmem>>, vector<8x256xf32>
    %cst_26 = arith.constant 0.000000e+00 : f32
    %36 = vector.broadcast %cst_26 : f32 to vector<8x256xf32>
    %37 = arith.select %8, %35, %36 : vector<8x256xi1>, vector<8x256xf32>
    %c40 = arith.constant 40 : index
    %c0_27 = arith.constant 0 : index
    %38 = vector.load %arg8[%c40, %c0_27] : memref<72x256xf32, #tpu.memory_space<vmem>>, vector<8x256xf32>
    tpu.vector_store %arg8[%c40, %c0_27], %37 {strides = array<i32>} : memref<72x256xf32, #tpu.memory_space<vmem>>, vector<8x256xf32>,
    %c0_28 = arith.constant 0 : index
    %c143 = arith.constant 143 : index
    %39 = vector.load %arg7[%c0_28, %c143] : memref<8x512xf32, #tpu.memory_space<vmem>>, vector<8x256xf32>
    %cst_29 = arith.constant 0.000000e+00 : f32
    %40 = vector.broadcast %cst_29 : f32 to vector<8x256xf32>
    %41 = arith.select %6, %39, %40 : vector<8x256xi1>, vector<8x256xf32>
    %c48 = arith.constant 48 : index
    %c0_30 = arith.constant 0 : index
    %42 = vector.load %arg8[%c48, %c0_30] : memref<72x256xf32, #tpu.memory_space<vmem>>, vector<8x256xf32>
    tpu.vector_store %arg8[%c48, %c0_30], %41 {strides = array<i32>} : memref<72x256xf32, #tpu.memory_space<vmem>>, vector<8x256xf32>,
    %c0_31 = arith.constant 0 : index
    %c144 = arith.constant 144 : index
    %43 = vector.load %arg7[%c0_31, %c144] : memref<8x512xf32, #tpu.memory_space<vmem>>, vector<8x256xf32>
    %c56 = arith.constant 56 : index
    %c0_32 = arith.constant 0 : index
    %44 = vector.load %arg8[%c56, %c0_32] : memref<72x256xf32, #tpu.memory_space<vmem>>, vector<8x256xf32>
    tpu.vector_store %arg8[%c56, %c0_32], %43 {strides = array<i32>} : memref<72x256xf32, #tpu.memory_space<vmem>>, vector<8x256xf32>,
    %c0_33 = arith.constant 0 : index
    %c145 = arith.constant 145 : index
    %45 = vector.load %arg7[%c0_33, %c145] : memref<8x512xf32, #tpu.memory_space<vmem>>, vector<8x256xf32>
    %cst_34 = arith.constant 0.000000e+00 : f32
    %46 = vector.broadcast %cst_34 : f32 to vector<8x256xf32>
    %47 = arith.select %8, %45, %46 : vector<8x256xi1>, vector<8x256xf32>
    %c64 = arith.constant 64 : index
    %c0_35 = arith.constant 0 : index
    %48 = vector.load %arg8[%c64, %c0_35] : memref<72x256xf32, #tpu.memory_space<vmem>>, vector<8x256xf32>
    tpu.vector_store %arg8[%c64, %c0_35], %47 {strides = array<i32>} : memref<72x256xf32, #tpu.memory_space<vmem>>, vector<8x256xf32>,
    %c0_36 = arith.constant 0 : index
    %c0_37 = arith.constant 0 : index
    %c0_38 = arith.constant 0 : index
    %49 = vector.load %arg3[%c0_36, %c0_37, %c0_38] : memref<4x8x72xf32, #tpu.memory_space<vmem>>, vector<1x8x72xf32>
    %50 = vector.shape_cast %49 : vector<1x8x72xf32> to vector<8x72xf32>
    %c0_39 = arith.constant 0 : index
    %c0_40 = arith.constant 0 : index
    %51 = vector.load %arg8[%c0_39, %c0_40] : memref<72x256xf32, #tpu.memory_space<vmem>>, vector<72x256xf32>
    %cst_41 = arith.constant dense<0.000000e+00> : vector<8x256xf32>
    %52 = tpu.matmul %50, %51, %cst_41 {dimension_numbers = #tpu.dot_dimension_numbers<[1], [0], [0], [1], [0, 0, 1, 1], [], []>} : vector<8x72xf32>, vector<72x256xf32>, vector<8x256xf32> -> vector<8x256xf32>
    %c0_42 = arith.constant 0 : index
    %c0_43 = arith.constant 0 : index
    %c0_44 = arith.constant 0 : index
    %53 = vector.load %arg4[%c0_42, %c0_43, %c0_44] : memref<4x8x1xf32, #tpu.memory_space<vmem>>, vector<1x8x1xf32>
    %54 = vector.shape_cast %53 : vector<1x8x1xf32> to vector<8x1xf32>
    %55 = vector.broadcast %54 : vector<8x1xf32> to vector<8x256xf32>
    %56 = arith.addf %52, %55 : vector<8x256xf32>
    %c1 = arith.constant 1 : index
    %c0_45 = arith.constant 0 : index
    %c0_46 = arith.constant 0 : index
    %57 = vector.load %arg2[%c1, %c0_45, %c0_46] : memref<4x8x1xf32, #tpu.memory_space<vmem>>, vector<1x8x1xf32>
    %58 = vector.shape_cast %57 : vector<1x8x1xf32> to vector<8x1xf32>
    %cst_47 = arith.constant 0.000000e+00 : f32
    %59 = vector.broadcast %cst_47 : f32 to vector<8x256xf32>
    %60 = arith.cmpf ogt, %56, %59 : vector<8x256xf32>
    %61 = vector.broadcast %58 : vector<8x1xf32> to vector<8x256xf32>
    %62 = arith.mulf %56, %61 : vector<8x256xf32>
    %63 = arith.select %60, %56, %62 : vector<8x256xi1>, vector<8x256xf32>
    %c0_48 = arith.constant 0 : index
    %c128_49 = arith.constant 128 : index
    %64 = vector.load %arg7[%c0_48, %c128_49] : memref<8x512xf32, #tpu.memory_space<vmem>>, vector<8x256xf32>
    tpu.vector_store %arg7[%c0_48, %c128_49], %63 {strides = array<i32>} : memref<8x512xf32, #tpu.memory_space<vmem>>, vector<8x256xf32>,
    %c0_50 = arith.constant 0 : index
    %c111_51 = arith.constant 111 : index
    %65 = vector.load %arg7[%c0_50, %c111_51] : memref<8x512xf32, #tpu.memory_space<vmem>>, vector<8x256xf32>
    %cst_52 = arith.constant 0.000000e+00 : f32
    %66 = vector.broadcast %cst_52 : f32 to vector<8x256xf32>
    %67 = arith.select %6, %65, %66 : vector<8x256xi1>, vector<8x256xf32>
    %c0_53 = arith.constant 0 : index
    %c0_54 = arith.constant 0 : index
    %68 = vector.load %arg8[%c0_53, %c0_54] : memref<72x256xf32, #tpu.memory_space<vmem>>, vector<8x256xf32>
    tpu.vector_store %arg8[%c0_53, %c0_54], %67 {strides = array<i32>} : memref<72x256xf32, #tpu.memory_space<vmem>>, vector<8x256xf32>,
    %c0_55 = arith.constant 0 : index
    %c112_56 = arith.constant 112 : index
    %69 = vector.load %arg7[%c0_55, %c112_56] : memref<8x512xf32, #tpu.memory_space<vmem>>, vector<8x256xf32>
    %c8_57 = arith.constant 8 : index
    %c0_58 = arith.constant 0 : index
    %70 = vector.load %arg8[%c8_57, %c0_58] : memref<72x256xf32, #tpu.memory_space<vmem>>, vector<8x256xf32>
    tpu.vector_store %arg8[%c8_57, %c0_58], %69 {strides = array<i32>} : memref<72x256xf32, #tpu.memory_space<vmem>>, vector<8x256xf32>,
    %c0_59 = arith.constant 0 : index
    %c113_60 = arith.constant 113 : index
    %71 = vector.load %arg7[%c0_59, %c113_60] : memref<8x512xf32, #tpu.memory_space<vmem>>, vector<8x256xf32>
    %cst_61 = arith.constant 0.000000e+00 : f32
    %72 = vector.broadcast %cst_61 : f32 to vector<8x256xf32>
    %73 = arith.select %8, %71, %72 : vector<8x256xi1>, vector<8x256xf32>
    %c16_62 = arith.constant 16 : index
    %c0_63 = arith.constant 0 : index
    %74 = vector.load %arg8[%c16_62, %c0_63] : memref<72x256xf32, #tpu.memory_space<vmem>>, vector<8x256xf32>
    tpu.vector_store %arg8[%c16_62, %c0_63], %73 {strides = array<i32>} : memref<72x256xf32, #tpu.memory_space<vmem>>, vector<8x256xf32>,
    %c0_64 = arith.constant 0 : index
    %c127_65 = arith.constant 127 : index
    %75 = vector.load %arg7[%c0_64, %c127_65] : memref<8x512xf32, #tpu.memory_space<vmem>>, vector<8x256xf32>
    %cst_66 = arith.constant 0.000000e+00 : f32
    %76 = vector.broadcast %cst_66 : f32 to vector<8x256xf32>
    %77 = arith.select %6, %75, %76 : vector<8x256xi1>, vector<8x256xf32>
    %c24_67 = arith.constant 24 : index
    %c0_68 = arith.constant 0 : index
    %78 = vector.load %arg8[%c24_67, %c0_68] : memref<72x256xf32, #tpu.memory_space<vmem>>, vector<8x256xf32>
    tpu.vector_store %arg8[%c24_67, %c0_68], %77 {strides = array<i32>} : memref<72x256xf32, #tpu.memory_space<vmem>>, vector<8x256xf32>,
    %c0_69 = arith.constant 0 : index
    %c128_70 = arith.constant 128 : index
    %79 = vector.load %arg7[%c0_69, %c128_70] : memref<8x512xf32, #tpu.memory_space<vmem>>, vector<8x256xf32>
    %c32_71 = arith.constant 32 : index
    %c0_72 = arith.constant 0 : index
    %80 = vector.load %arg8[%c32_71, %c0_72] : memref<72x256xf32, #tpu.memory_space<vmem>>, vector<8x256xf32>
    tpu.vector_store %arg8[%c32_71, %c0_72], %79 {strides = array<i32>} : memref<72x256xf32, #tpu.memory_space<vmem>>, vector<8x256xf32>,
    %c0_73 = arith.constant 0 : index
    %c129_74 = arith.constant 129 : index
    %81 = vector.load %arg7[%c0_73, %c129_74] : memref<8x512xf32, #tpu.memory_space<vmem>>, vector<8x256xf32>
    %cst_75 = arith.constant 0.000000e+00 : f32
    %82 = vector.broadcast %cst_75 : f32 to vector<8x256xf32>
    %83 = arith.select %8, %81, %82 : vector<8x256xi1>, vector<8x256xf32>
    %c40_76 = arith.constant 40 : index
    %c0_77 = arith.constant 0 : index
    %84 = vector.load %arg8[%c40_76, %c0_77] : memref<72x256xf32, #tpu.memory_space<vmem>>, vector<8x256xf32>
    tpu.vector_store %arg8[%c40_76, %c0_77], %83 {strides = array<i32>} : memref<72x256xf32, #tpu.memory_space<vmem>>, vector<8x256xf32>,
    %c0_78 = arith.constant 0 : index
    %c143_79 = arith.constant 143 : index
    %85 = vector.load %arg7[%c0_78, %c143_79] : memref<8x512xf32, #tpu.memory_space<vmem>>, vector<8x256xf32>
    %cst_80 = arith.constant 0.000000e+00 : f32
    %86 = vector.broadcast %cst_80 : f32 to vector<8x256xf32>
    %87 = arith.select %6, %85, %86 : vector<8x256xi1>, vector<8x256xf32>
    %c48_81 = arith.constant 48 : index
    %c0_82 = arith.constant 0 : index
    %88 = vector.load %arg8[%c48_81, %c0_82] : memref<72x256xf32, #tpu.memory_space<vmem>>, vector<8x256xf32>
    tpu.vector_store %arg8[%c48_81, %c0_82], %87 {strides = array<i32>} : memref<72x256xf32, #tpu.memory_space<vmem>>, vector<8x256xf32>,
    %c0_83 = arith.constant 0 : index
    %c144_84 = arith.constant 144 : index
    %89 = vector.load %arg7[%c0_83, %c144_84] : memref<8x512xf32, #tpu.memory_space<vmem>>, vector<8x256xf32>
    %c56_85 = arith.constant 56 : index
    %c0_86 = arith.constant 0 : index
    %90 = vector.load %arg8[%c56_85, %c0_86] : memref<72x256xf32, #tpu.memory_space<vmem>>, vector<8x256xf32>
    tpu.vector_store %arg8[%c56_85, %c0_86], %89 {strides = array<i32>} : memref<72x256xf32, #tpu.memory_space<vmem>>, vector<8x256xf32>,
    %c0_87 = arith.constant 0 : index
    %c145_88 = arith.constant 145 : index
    %91 = vector.load %arg7[%c0_87, %c145_88] : memref<8x512xf32, #tpu.memory_space<vmem>>, vector<8x256xf32>
    %cst_89 = arith.constant 0.000000e+00 : f32
    %92 = vector.broadcast %cst_89 : f32 to vector<8x256xf32>
    %93 = arith.select %8, %91, %92 : vector<8x256xi1>, vector<8x256xf32>
    %c64_90 = arith.constant 64 : index
    %c0_91 = arith.constant 0 : index
    %94 = vector.load %arg8[%c64_90, %c0_91] : memref<72x256xf32, #tpu.memory_space<vmem>>, vector<8x256xf32>
    tpu.vector_store %arg8[%c64_90, %c0_91], %93 {strides = array<i32>} : memref<72x256xf32, #tpu.memory_space<vmem>>, vector<8x256xf32>,
    %c1_92 = arith.constant 1 : index
    %c0_93 = arith.constant 0 : index
    %c0_94 = arith.constant 0 : index
    %95 = vector.load %arg3[%c1_92, %c0_93, %c0_94] : memref<4x8x72xf32, #tpu.memory_space<vmem>>, vector<1x8x72xf32>
    %96 = vector.shape_cast %95 : vector<1x8x72xf32> to vector<8x72xf32>
    %c0_95 = arith.constant 0 : index
    %c0_96 = arith.constant 0 : index
    %97 = vector.load %arg8[%c0_95, %c0_96] : memref<72x256xf32, #tpu.memory_space<vmem>>, vector<72x256xf32>
    %cst_97 = arith.constant dense<0.000000e+00> : vector<8x256xf32>
    %98 = tpu.matmul %96, %97, %cst_97 {dimension_numbers = #tpu.dot_dimension_numbers<[1], [0], [0], [1], [0, 0, 1, 1], [], []>} : vector<8x72xf32>, vector<72x256xf32>, vector<8x256xf32> -> vector<8x256xf32>
    %c1_98 = arith.constant 1 : index
    %c0_99 = arith.constant 0 : index
    %c0_100 = arith.constant 0 : index
    %99 = vector.load %arg4[%c1_98, %c0_99, %c0_100] : memref<4x8x1xf32, #tpu.memory_space<vmem>>, vector<1x8x1xf32>
    %100 = vector.shape_cast %99 : vector<1x8x1xf32> to vector<8x1xf32>
    %101 = vector.broadcast %100 : vector<8x1xf32> to vector<8x256xf32>
    %102 = arith.addf %98, %101 : vector<8x256xf32>
    %103 = arith.addf %102, %10 : vector<8x256xf32>
    %c2 = arith.constant 2 : index
    %c0_101 = arith.constant 0 : index
    %c0_102 = arith.constant 0 : index
    %104 = vector.load %arg2[%c2, %c0_101, %c0_102] : memref<4x8x1xf32, #tpu.memory_space<vmem>>, vector<1x8x1xf32>
    %105 = vector.shape_cast %104 : vector<1x8x1xf32> to vector<8x1xf32>
    %cst_103 = arith.constant 0.000000e+00 : f32
    %106 = vector.broadcast %cst_103 : f32 to vector<8x256xf32>
    %107 = arith.cmpf ogt, %103, %106 : vector<8x256xf32>
    %108 = vector.broadcast %105 : vector<8x1xf32> to vector<8x256xf32>
    %109 = arith.mulf %103, %108 : vector<8x256xf32>
    %110 = arith.select %107, %103, %109 : vector<8x256xi1>, vector<8x256xf32>
    %c0_104 = arith.constant 0 : index
    %c128_105 = arith.constant 128 : index
    %111 = vector.load %arg7[%c0_104, %c128_105] : memref<8x512xf32, #tpu.memory_space<vmem>>, vector<8x256xf32>
    tpu.vector_store %arg7[%c0_104, %c128_105], %110 {strides = array<i32>} : memref<8x512xf32, #tpu.memory_space<vmem>>, vector<8x256xf32>,
    %c0_106 = arith.constant 0 : index
    %c111_107 = arith.constant 111 : index
    %112 = vector.load %arg7[%c0_106, %c111_107] : memref<8x512xf32, #tpu.memory_space<vmem>>, vector<8x256xf32>
    %cst_108 = arith.constant 0.000000e+00 : f32
    %113 = vector.broadcast %cst_108 : f32 to vector<8x256xf32>
    %114 = arith.select %6, %112, %113 : vector<8x256xi1>, vector<8x256xf32>
    %c0_109 = arith.constant 0 : index
    %c0_110 = arith.constant 0 : index
    %115 = vector.load %arg8[%c0_109, %c0_110] : memref<72x256xf32, #tpu.memory_space<vmem>>, vector<8x256xf32>
    tpu.vector_store %arg8[%c0_109, %c0_110], %114 {strides = array<i32>} : memref<72x256xf32, #tpu.memory_space<vmem>>, vector<8x256xf32>,
    %c0_111 = arith.constant 0 : index
    %c112_112 = arith.constant 112 : index
    %116 = vector.load %arg7[%c0_111, %c112_112] : memref<8x512xf32, #tpu.memory_space<vmem>>, vector<8x256xf32>
    %c8_113 = arith.constant 8 : index
    %c0_114 = arith.constant 0 : index
    %117 = vector.load %arg8[%c8_113, %c0_114] : memref<72x256xf32, #tpu.memory_space<vmem>>, vector<8x256xf32>
    tpu.vector_store %arg8[%c8_113, %c0_114], %116 {strides = array<i32>} : memref<72x256xf32, #tpu.memory_space<vmem>>, vector<8x256xf32>,
    %c0_115 = arith.constant 0 : index
    %c113_116 = arith.constant 113 : index
    %118 = vector.load %arg7[%c0_115, %c113_116] : memref<8x512xf32, #tpu.memory_space<vmem>>, vector<8x256xf32>
    %cst_117 = arith.constant 0.000000e+00 : f32
    %119 = vector.broadcast %cst_117 : f32 to vector<8x256xf32>
    %120 = arith.select %8, %118, %119 : vector<8x256xi1>, vector<8x256xf32>
    %c16_118 = arith.constant 16 : index
    %c0_119 = arith.constant 0 : index
    %121 = vector.load %arg8[%c16_118, %c0_119] : memref<72x256xf32, #tpu.memory_space<vmem>>, vector<8x256xf32>
    tpu.vector_store %arg8[%c16_118, %c0_119], %120 {strides = array<i32>} : memref<72x256xf32, #tpu.memory_space<vmem>>, vector<8x256xf32>,
    %c0_120 = arith.constant 0 : index
    %c127_121 = arith.constant 127 : index
    %122 = vector.load %arg7[%c0_120, %c127_121] : memref<8x512xf32, #tpu.memory_space<vmem>>, vector<8x256xf32>
    %cst_122 = arith.constant 0.000000e+00 : f32
    %123 = vector.broadcast %cst_122 : f32 to vector<8x256xf32>
    %124 = arith.select %6, %122, %123 : vector<8x256xi1>, vector<8x256xf32>
    %c24_123 = arith.constant 24 : index
    %c0_124 = arith.constant 0 : index
    %125 = vector.load %arg8[%c24_123, %c0_124] : memref<72x256xf32, #tpu.memory_space<vmem>>, vector<8x256xf32>
    tpu.vector_store %arg8[%c24_123, %c0_124], %124 {strides = array<i32>} : memref<72x256xf32, #tpu.memory_space<vmem>>, vector<8x256xf32>,
    %c0_125 = arith.constant 0 : index
    %c128_126 = arith.constant 128 : index
    %126 = vector.load %arg7[%c0_125, %c128_126] : memref<8x512xf32, #tpu.memory_space<vmem>>, vector<8x256xf32>
    %c32_127 = arith.constant 32 : index
    %c0_128 = arith.constant 0 : index
    %127 = vector.load %arg8[%c32_127, %c0_128] : memref<72x256xf32, #tpu.memory_space<vmem>>, vector<8x256xf32>
    tpu.vector_store %arg8[%c32_127, %c0_128], %126 {strides = array<i32>} : memref<72x256xf32, #tpu.memory_space<vmem>>, vector<8x256xf32>,
    %c0_129 = arith.constant 0 : index
    %c129_130 = arith.constant 129 : index
    %128 = vector.load %arg7[%c0_129, %c129_130] : memref<8x512xf32, #tpu.memory_space<vmem>>, vector<8x256xf32>
    %cst_131 = arith.constant 0.000000e+00 : f32
    %129 = vector.broadcast %cst_131 : f32 to vector<8x256xf32>
    %130 = arith.select %8, %128, %129 : vector<8x256xi1>, vector<8x256xf32>
    %c40_132 = arith.constant 40 : index
    %c0_133 = arith.constant 0 : index
    %131 = vector.load %arg8[%c40_132, %c0_133] : memref<72x256xf32, #tpu.memory_space<vmem>>, vector<8x256xf32>
    tpu.vector_store %arg8[%c40_132, %c0_133], %130 {strides = array<i32>} : memref<72x256xf32, #tpu.memory_space<vmem>>, vector<8x256xf32>,
    %c0_134 = arith.constant 0 : index
    %c143_135 = arith.constant 143 : index
    %132 = vector.load %arg7[%c0_134, %c143_135] : memref<8x512xf32, #tpu.memory_space<vmem>>, vector<8x256xf32>
    %cst_136 = arith.constant 0.000000e+00 : f32
    %133 = vector.broadcast %cst_136 : f32 to vector<8x256xf32>
    %134 = arith.select %6, %132, %133 : vector<8x256xi1>, vector<8x256xf32>
    %c48_137 = arith.constant 48 : index
    %c0_138 = arith.constant 0 : index
    %135 = vector.load %arg8[%c48_137, %c0_138] : memref<72x256xf32, #tpu.memory_space<vmem>>, vector<8x256xf32>
    tpu.vector_store %arg8[%c48_137, %c0_138], %134 {strides = array<i32>} : memref<72x256xf32, #tpu.memory_space<vmem>>, vector<8x256xf32>,
    %c0_139 = arith.constant 0 : index
    %c144_140 = arith.constant 144 : index
    %136 = vector.load %arg7[%c0_139, %c144_140] : memref<8x512xf32, #tpu.memory_space<vmem>>, vector<8x256xf32>
    %c56_141 = arith.constant 56 : index
    %c0_142 = arith.constant 0 : index
    %137 = vector.load %arg8[%c56_141, %c0_142] : memref<72x256xf32, #tpu.memory_space<vmem>>, vector<8x256xf32>
    tpu.vector_store %arg8[%c56_141, %c0_142], %136 {strides = array<i32>} : memref<72x256xf32, #tpu.memory_space<vmem>>, vector<8x256xf32>,
    %c0_143 = arith.constant 0 : index
    %c145_144 = arith.constant 145 : index
    %138 = vector.load %arg7[%c0_143, %c145_144] : memref<8x512xf32, #tpu.memory_space<vmem>>, vector<8x256xf32>
    %cst_145 = arith.constant 0.000000e+00 : f32
    %139 = vector.broadcast %cst_145 : f32 to vector<8x256xf32>
    %140 = arith.select %8, %138, %139 : vector<8x256xi1>, vector<8x256xf32>
    %c64_146 = arith.constant 64 : index
    %c0_147 = arith.constant 0 : index
    %141 = vector.load %arg8[%c64_146, %c0_147] : memref<72x256xf32, #tpu.memory_space<vmem>>, vector<8x256xf32>
    tpu.vector_store %arg8[%c64_146, %c0_147], %140 {strides = array<i32>} : memref<72x256xf32, #tpu.memory_space<vmem>>, vector<8x256xf32>,
    %c2_148 = arith.constant 2 : index
    %c0_149 = arith.constant 0 : index
    %c0_150 = arith.constant 0 : index
    %142 = vector.load %arg3[%c2_148, %c0_149, %c0_150] : memref<4x8x72xf32, #tpu.memory_space<vmem>>, vector<1x8x72xf32>
    %143 = vector.shape_cast %142 : vector<1x8x72xf32> to vector<8x72xf32>
    %c0_151 = arith.constant 0 : index
    %c0_152 = arith.constant 0 : index
    %144 = vector.load %arg8[%c0_151, %c0_152] : memref<72x256xf32, #tpu.memory_space<vmem>>, vector<72x256xf32>
    %cst_153 = arith.constant dense<0.000000e+00> : vector<8x256xf32>
    %145 = tpu.matmul %143, %144, %cst_153 {dimension_numbers = #tpu.dot_dimension_numbers<[1], [0], [0], [1], [0, 0, 1, 1], [], []>} : vector<8x72xf32>, vector<72x256xf32>, vector<8x256xf32> -> vector<8x256xf32>
    %c2_154 = arith.constant 2 : index
    %c0_155 = arith.constant 0 : index
    %c0_156 = arith.constant 0 : index
    %146 = vector.load %arg4[%c2_154, %c0_155, %c0_156] : memref<4x8x1xf32, #tpu.memory_space<vmem>>, vector<1x8x1xf32>
    %147 = vector.shape_cast %146 : vector<1x8x1xf32> to vector<8x1xf32>
    %148 = vector.broadcast %147 : vector<8x1xf32> to vector<8x256xf32>
    %149 = arith.addf %145, %148 : vector<8x256xf32>
    %c3 = arith.constant 3 : index
    %c0_157 = arith.constant 0 : index
    %c0_158 = arith.constant 0 : index
    %150 = vector.load %arg2[%c3, %c0_157, %c0_158] : memref<4x8x1xf32, #tpu.memory_space<vmem>>, vector<1x8x1xf32>
    %151 = vector.shape_cast %150 : vector<1x8x1xf32> to vector<8x1xf32>
    %cst_159 = arith.constant 0.000000e+00 : f32
    %152 = vector.broadcast %cst_159 : f32 to vector<8x256xf32>
    %153 = arith.cmpf ogt, %149, %152 : vector<8x256xf32>
    %154 = vector.broadcast %151 : vector<8x1xf32> to vector<8x256xf32>
    %155 = arith.mulf %149, %154 : vector<8x256xf32>
    %156 = arith.select %153, %149, %155 : vector<8x256xi1>, vector<8x256xf32>
    %c0_160 = arith.constant 0 : index
    %c128_161 = arith.constant 128 : index
    %157 = vector.load %arg7[%c0_160, %c128_161] : memref<8x512xf32, #tpu.memory_space<vmem>>, vector<8x256xf32>
    tpu.vector_store %arg7[%c0_160, %c128_161], %156 {strides = array<i32>} : memref<8x512xf32, #tpu.memory_space<vmem>>, vector<8x256xf32>,
    %c0_162 = arith.constant 0 : index
    %c111_163 = arith.constant 111 : index
    %158 = vector.load %arg7[%c0_162, %c111_163] : memref<8x512xf32, #tpu.memory_space<vmem>>, vector<8x256xf32>
    %cst_164 = arith.constant 0.000000e+00 : f32
    %159 = vector.broadcast %cst_164 : f32 to vector<8x256xf32>
    %160 = arith.select %6, %158, %159 : vector<8x256xi1>, vector<8x256xf32>
    %c0_165 = arith.constant 0 : index
    %c0_166 = arith.constant 0 : index
    %161 = vector.load %arg8[%c0_165, %c0_166] : memref<72x256xf32, #tpu.memory_space<vmem>>, vector<8x256xf32>
    tpu.vector_store %arg8[%c0_165, %c0_166], %160 {strides = array<i32>} : memref<72x256xf32, #tpu.memory_space<vmem>>, vector<8x256xf32>,
    %c0_167 = arith.constant 0 : index
    %c112_168 = arith.constant 112 : index
    %162 = vector.load %arg7[%c0_167, %c112_168] : memref<8x512xf32, #tpu.memory_space<vmem>>, vector<8x256xf32>
    %c8_169 = arith.constant 8 : index
    %c0_170 = arith.constant 0 : index
    %163 = vector.load %arg8[%c8_169, %c0_170] : memref<72x256xf32, #tpu.memory_space<vmem>>, vector<8x256xf32>
    tpu.vector_store %arg8[%c8_169, %c0_170], %162 {strides = array<i32>} : memref<72x256xf32, #tpu.memory_space<vmem>>, vector<8x256xf32>,
    %c0_171 = arith.constant 0 : index
    %c113_172 = arith.constant 113 : index
    %164 = vector.load %arg7[%c0_171, %c113_172] : memref<8x512xf32, #tpu.memory_space<vmem>>, vector<8x256xf32>
    %cst_173 = arith.constant 0.000000e+00 : f32
    %165 = vector.broadcast %cst_173 : f32 to vector<8x256xf32>
    %166 = arith.select %8, %164, %165 : vector<8x256xi1>, vector<8x256xf32>
    %c16_174 = arith.constant 16 : index
    %c0_175 = arith.constant 0 : index
    %167 = vector.load %arg8[%c16_174, %c0_175] : memref<72x256xf32, #tpu.memory_space<vmem>>, vector<8x256xf32>
    tpu.vector_store %arg8[%c16_174, %c0_175], %166 {strides = array<i32>} : memref<72x256xf32, #tpu.memory_space<vmem>>, vector<8x256xf32>,
    %c0_176 = arith.constant 0 : index
    %c127_177 = arith.constant 127 : index
    %168 = vector.load %arg7[%c0_176, %c127_177] : memref<8x512xf32, #tpu.memory_space<vmem>>, vector<8x256xf32>
    %cst_178 = arith.constant 0.000000e+00 : f32
    %169 = vector.broadcast %cst_178 : f32 to vector<8x256xf32>
    %170 = arith.select %6, %168, %169 : vector<8x256xi1>, vector<8x256xf32>
    %c24_179 = arith.constant 24 : index
    %c0_180 = arith.constant 0 : index
    %171 = vector.load %arg8[%c24_179, %c0_180] : memref<72x256xf32, #tpu.memory_space<vmem>>, vector<8x256xf32>
    tpu.vector_store %arg8[%c24_179, %c0_180], %170 {strides = array<i32>} : memref<72x256xf32, #tpu.memory_space<vmem>>, vector<8x256xf32>,
    %c0_181 = arith.constant 0 : index
    %c128_182 = arith.constant 128 : index
    %172 = vector.load %arg7[%c0_181, %c128_182] : memref<8x512xf32, #tpu.memory_space<vmem>>, vector<8x256xf32>
    %c32_183 = arith.constant 32 : index
    %c0_184 = arith.constant 0 : index
    %173 = vector.load %arg8[%c32_183, %c0_184] : memref<72x256xf32, #tpu.memory_space<vmem>>, vector<8x256xf32>
    tpu.vector_store %arg8[%c32_183, %c0_184], %172 {strides = array<i32>} : memref<72x256xf32, #tpu.memory_space<vmem>>, vector<8x256xf32>,
    %c0_185 = arith.constant 0 : index
    %c129_186 = arith.constant 129 : index
    %174 = vector.load %arg7[%c0_185, %c129_186] : memref<8x512xf32, #tpu.memory_space<vmem>>, vector<8x256xf32>
    %cst_187 = arith.constant 0.000000e+00 : f32
    %175 = vector.broadcast %cst_187 : f32 to vector<8x256xf32>
    %176 = arith.select %8, %174, %175 : vector<8x256xi1>, vector<8x256xf32>
    %c40_188 = arith.constant 40 : index
    %c0_189 = arith.constant 0 : index
    %177 = vector.load %arg8[%c40_188, %c0_189] : memref<72x256xf32, #tpu.memory_space<vmem>>, vector<8x256xf32>
    tpu.vector_store %arg8[%c40_188, %c0_189], %176 {strides = array<i32>} : memref<72x256xf32, #tpu.memory_space<vmem>>, vector<8x256xf32>,
    %c0_190 = arith.constant 0 : index
    %c143_191 = arith.constant 143 : index
    %178 = vector.load %arg7[%c0_190, %c143_191] : memref<8x512xf32, #tpu.memory_space<vmem>>, vector<8x256xf32>
    %cst_192 = arith.constant 0.000000e+00 : f32
    %179 = vector.broadcast %cst_192 : f32 to vector<8x256xf32>
    %180 = arith.select %6, %178, %179 : vector<8x256xi1>, vector<8x256xf32>
    %c48_193 = arith.constant 48 : index
    %c0_194 = arith.constant 0 : index
    %181 = vector.load %arg8[%c48_193, %c0_194] : memref<72x256xf32, #tpu.memory_space<vmem>>, vector<8x256xf32>
    tpu.vector_store %arg8[%c48_193, %c0_194], %180 {strides = array<i32>} : memref<72x256xf32, #tpu.memory_space<vmem>>, vector<8x256xf32>,
    %c0_195 = arith.constant 0 : index
    %c144_196 = arith.constant 144 : index
    %182 = vector.load %arg7[%c0_195, %c144_196] : memref<8x512xf32, #tpu.memory_space<vmem>>, vector<8x256xf32>
    %c56_197 = arith.constant 56 : index
    %c0_198 = arith.constant 0 : index
    %183 = vector.load %arg8[%c56_197, %c0_198] : memref<72x256xf32, #tpu.memory_space<vmem>>, vector<8x256xf32>
    tpu.vector_store %arg8[%c56_197, %c0_198], %182 {strides = array<i32>} : memref<72x256xf32, #tpu.memory_space<vmem>>, vector<8x256xf32>,
    %c0_199 = arith.constant 0 : index
    %c145_200 = arith.constant 145 : index
    %184 = vector.load %arg7[%c0_199, %c145_200] : memref<8x512xf32, #tpu.memory_space<vmem>>, vector<8x256xf32>
    %cst_201 = arith.constant 0.000000e+00 : f32
    %185 = vector.broadcast %cst_201 : f32 to vector<8x256xf32>
    %186 = arith.select %8, %184, %185 : vector<8x256xi1>, vector<8x256xf32>
    %c64_202 = arith.constant 64 : index
    %c0_203 = arith.constant 0 : index
    %187 = vector.load %arg8[%c64_202, %c0_203] : memref<72x256xf32, #tpu.memory_space<vmem>>, vector<8x256xf32>
    tpu.vector_store %arg8[%c64_202, %c0_203], %186 {strides = array<i32>} : memref<72x256xf32, #tpu.memory_space<vmem>>, vector<8x256xf32>,
    %c3_204 = arith.constant 3 : index
    %c0_205 = arith.constant 0 : index
    %c0_206 = arith.constant 0 : index
    %188 = vector.load %arg3[%c3_204, %c0_205, %c0_206] : memref<4x8x72xf32, #tpu.memory_space<vmem>>, vector<1x8x72xf32>
    %189 = vector.shape_cast %188 : vector<1x8x72xf32> to vector<8x72xf32>
    %c0_207 = arith.constant 0 : index
    %c0_208 = arith.constant 0 : index
    %190 = vector.load %arg8[%c0_207, %c0_208] : memref<72x256xf32, #tpu.memory_space<vmem>>, vector<72x256xf32>
    %cst_209 = arith.constant dense<0.000000e+00> : vector<8x256xf32>
    %191 = tpu.matmul %189, %190, %cst_209 {dimension_numbers = #tpu.dot_dimension_numbers<[1], [0], [0], [1], [0, 0, 1, 1], [], []>} : vector<8x72xf32>, vector<72x256xf32>, vector<8x256xf32> -> vector<8x256xf32>
    %c3_210 = arith.constant 3 : index
    %c0_211 = arith.constant 0 : index
    %c0_212 = arith.constant 0 : index
    %192 = vector.load %arg4[%c3_210, %c0_211, %c0_212] : memref<4x8x1xf32, #tpu.memory_space<vmem>>, vector<1x8x1xf32>
    %193 = vector.shape_cast %192 : vector<1x8x1xf32> to vector<8x1xf32>
    %194 = vector.broadcast %193 : vector<8x1xf32> to vector<8x256xf32>
    %195 = arith.addf %191, %194 : vector<8x256xf32>
    %c0_213 = arith.constant 0 : index
    %c0_214 = arith.constant 0 : index
    %196 = memref.load %arg5[%c0_213, %c0_214] : memref<1x1xf32, #tpu.memory_space<smem>>
    %197 = arith.addf %195, %102 : vector<8x256xf32>
    %198 = vector.broadcast %196 : f32 to vector<8x256xf32>
    %199 = arith.mulf %197, %198 : vector<8x256xf32>
    %200 = arith.addf %199, %10 : vector<8x256xf32>
    %c0_215 = arith.constant 0 : index
    %c0_216 = arith.constant 0 : index
    %c0_217 = arith.constant 0 : index
    %201 = vector.load %arg6[%c0_215, %c0_216, %c0_217] : memref<1x8x256xf32, #tpu.memory_space<vmem>>, vector<1x8x256xf32>
    %202 = vector.shape_cast %201 : vector<1x8x256xf32> to vector<8x256xf32>
    %203 = vector.shape_cast %200 : vector<8x256xf32> to vector<1x8x256xf32>
    tpu.vector_store %arg6[%c0_215, %c0_216, %c0_217], %203 {strides = array<i32>} : memref<1x8x256xf32, #tpu.memory_space<vmem>>, vector<1x8x256xf32>,
    return
  }
  func.func @transform_0(%arg0: i32) -> (i32, i32, i32) {
    %c0_i32 = arith.constant 0 : i32
    %c0_i32_0 = arith.constant 0 : i32
    %c0_i32_1 = arith.constant 0 : i32
    return %arg0, %c0_i32, %c0_i32_0 : i32, i32, i32
  }
  func.func @transform_1(%arg0: i32) -> (i32, i32, i32) {
    %c0_i32 = arith.constant 0 : i32
    %c0_i32_0 = arith.constant 0 : i32
    %c0_i32_1 = arith.constant 0 : i32
    %c0_i32_2 = arith.constant 0 : i32
    return %c0_i32, %c0_i32_0, %c0_i32_1 : i32, i32, i32
  }
  func.func @transform_2(%arg0: i32) -> (i32, i32, i32) {
    %c0_i32 = arith.constant 0 : i32
    %c0_i32_0 = arith.constant 0 : i32
    %c0_i32_1 = arith.constant 0 : i32
    %c0_i32_2 = arith.constant 0 : i32
    return %c0_i32, %c0_i32_0, %c0_i32_1 : i32, i32, i32
  }
  func.func @transform_3(%arg0: i32) -> (i32, i32, i32) {
    %c0_i32 = arith.constant 0 : i32
    %c0_i32_0 = arith.constant 0 : i32
    %c0_i32_1 = arith.constant 0 : i32
    %c0_i32_2 = arith.constant 0 : i32
    return %c0_i32, %c0_i32_0, %c0_i32_1 : i32, i32, i32
  }
  func.func @transform_4(%arg0: i32) -> (i32, i32) {
    %c0_i32 = arith.constant 0 : i32
    %c0_i32_0 = arith.constant 0 : i32
    %c0_i32_1 = arith.constant 0 : i32
    return %c0_i32, %c0_i32_0 : i32, i32
  }
  func.func @transform_5(%arg0: i32) -> (i32, i32, i32) {
    %c0_i32 = arith.constant 0 : i32
    %c0_i32_0 = arith.constant 0 : i32
    %c0_i32_1 = arith.constant 0 : i32
    return %arg0, %c0_i32, %c0_i32_0 : i32, i32, i32
  }
}

</mosaic_0001>

<bundles_post_ra>
// kernel: res_block_forward.1
= control target key start
LH: loop header
LB: loop body
LE: loop exit
PB: predicated region body
PF: predicated region fallthrough
CT: control target
= control target key end

     0   :  { %s1563_s20 = smov 0   ;;  %s2012_s0 = inlined_call_operand.vmem [shape: f32[2,8,256], index: 0, kind: input, shape index: {}]   ;;  %s2013_s1 = inlined_call_operand.vmem [shape: f32[4,8,1], index: 1, kind: input, shape index: {}]   ;;  %s2014_s2 = inlined_call_operand.vmem [shape: f32[4,8,72], index: 2, kind: input, shape index: {}]   ;;  %s2015_s3 = inlined_call_operand.vmem [shape: f32[4,8,1], index: 3, kind: input, shape index: {}]   ;;  %s2016_s4 = inlined_call_operand.<no memory space> [shape: f32[1,1], index: 4, kind: input, shape index: {}]   ;;  %s2017_s5 = inlined_call_operand.vmem [shape: f32[2,8,256], index: 5, kind: output, shape index: {}]  }
   0x1   :  { %10 = sst [smem:[#allocation4]] %s2016_s4 }
   0x2 LB: > { %s1418_s21 = sadd.s32 4294967295, %s1518_s20   ;;  %p1422_p0 = scmp.ge.s32.totalorder %s1518_s20, 1  ;;  %s1518_s20 = sphi %s1563_s20, %s16_s20  }
   0x3   : > { %p188_p1 = scmp.lt.s32.totalorder %s1518_s20, 3 }
   0x5   : > { %p189_p2 = pnand %p1422_p0, %p188_p1 }
   0x6   : > { %s1522_s4 = smov (!%p189_p2), 111   ;;  %s1523_s24 = smov (!%p189_p2), 112  }
   0x7   : > { %192 = sbr.rel (%p189_p2) target bundleno = 1544 (0x608), region = 40  ;;  %s1524_s25 = smov (!%p189_p2), 113  }
   0x8   : > { %s1525_s26 = smov (!%p189_p2), 127   ;;  %s1526_s27 = smov (!%p189_p2), 15  }
   0x9   : > { %s1527_s28 = smov (!%p189_p2), 1   ;;  %s1528_s29 = smov (!%p189_p2), 16  }
   0xa   : > { %p216_p3 = scmp.lt.s32.totalorder (!%p189_p2), %s1418_s21, 1  ;;  %s1529_s9 = smov (!%p189_p2), 17  }
   0xc   : > { %v241_v0 = vld [vmem:[%s2013_s1] sm:$0xff]  ;;  %v1520_v1 = vmov 0   ;;  %v1521_v2 = vmov 0.0   ;;  %s2027_s21 = smov (!%p216_p3, %s1418_s21), 1  ;;  %v1428_v11 = vld [vmem:[%s2013_s1 + $0x8] sm:$0xff]  ;;  %v230_v15 = vlaneseq  ;;  %vm414_vm2 = vcmask 908288  }
   0xd   : > { %1510 = vset.pattern.permute.xlu0 %v1520_v1  ;;  %412 = vrot.lane.b32.xlu1 %v1521_v2, %s1522_s4  ;;  %s1442_s30 = sshll.u32 %s2027_s21, 4  ;;  %v442_v10 = vld [vmem:[%s2015_s3] sm:$0xff]  ;;  %vm395_vm5 = vcmask 916480   ;;  %vm374_vm6 = vcmask 924672   ;;  %vm353_vm9 = vcmask 1039360   ;;  %vm328_vm10 = vcmask 7168  }
   0xe   : > { %246 = vperm.xlu0 %1510, %v241_v0   ;;  %516 = vmatprep.mubr.f32.mxu0 %v1521_v2  ;;  %s220_s8 = scalar_lea.vmem %s2012_s0, %s1442_s30  ;;  %v231_v16 = vand.u32 127, %v230_v15  ;;  %vm307_vm11 = vcmask 121856   ;;  %vm288_vm12 = vcmask 130048   ;;  %vm267_vm13 = vcmask 138240   ;;  %v423_v60 = vld [vmem:[%s2014_s2] sm:$0xff]  ;;  %v1437_v24 = vld [vmem:[%s2014_s2 + $0x18] sm:$0xff] }
   0xf   : > { %1511 = vset.pattern.permute.xlu1 %v1520_v1  ;;  %792 = vmatprep.mubr.f32.mxu1 %v1521_v2  ;;  %v1598_v3 = vld [vmem:[%s220_s8] sm:$0xff]  ;;  %v1600_v4 = vld [vmem:[%s220_s8 + $0x8] sm:$0xff]  ;;  %vm448_vm14 = vcmask 588800  }
  0x10   : > { %vm242_vm0 = vcmp.gt.f32.partialorder %v1598_v3, 0.0  ;;  %vm243_vm1 = vcmp.gt.f32.partialorder %v1600_v4, 0.0  ;;  %v232_v19 = vadd.s32 128, %v231_v16  ;;  %v233_v23 = vand.u32 15, %v231_v16 }
  0x11   : > { %393 = vrot.lane.b32.xlu1 %v1521_v2, %s1523_s24 }
  0x12   : > { %372 = vrot.lane.b32.xlu0 %v1521_v2, %s1524_s25  ;;  %v234_v22 = vand.u32 15, %v232_v19  ;;  %vm1668_vm4 = vcmp.ne.s32.totalorder %v233_v23, 15  ;;  %vm1684_vm8 = vcmp.ne.s32.totalorder %v233_v23, 0 }
  0x14   : > { %vm1664_vm3 = vcmp.ne.s32.totalorder %v234_v22, 15  ;;  %vm1679_vm7 = vcmp.ne.s32.totalorder %v234_v22, 0 }
  0x15   : > { %351 = vrot.lane.b32.xlu1 %v1521_v2, %s1525_s26 }
  0x16   : > { %301 = vrot.lane.b32.xlu0 %v1521_v2, %s1526_s27 }
  0x19   : > { %322 = vrot.lane.b32.xlu1 %v1521_v2, %s1527_s28 }
  0x1d   : > { %282 = vrot.lane.b32.xlu1 %v1521_v2, %s1528_s29 }
  0x7f   : > { %v413_v12 = vpop.permute.xlu1 %412 }
  0x83   : > { %v394_v13 = vpop.permute.xlu1 %393 }
  0x87   : > { %v352_v14 = vpop.permute.xlu1 %351 }
  0x89   : > { %v247_v5 = vpop.permute.xlu0 %246 }
  0x8a   : > { %v249_v6 = vmul.f32 %v247_v5, %v1598_v3  ;;  %v250_v7 = vmul.f32 %v247_v5, %v1600_v4 }
  0x8b   : > { %v323_v17 = vpop.permute.xlu1 %322 }
  0x8c   : > { %v1607_v8 = vsel %vm242_vm0, %v1598_v3, %v249_v6  ;;  %v1610_v9 = vsel %vm243_vm1, %v1600_v4, %v250_v7 }
  0x8d   : > { %410 = vrot.lane.b32.xlu0 %v1610_v9, %s1522_s4  ;;  %408 = vrot.lane.b32.xlu1 %v1607_v8, %s1522_s4  ;;  %v373_v18 = vpop.permute.xlu0 %372 }
  0x8f   : > { %v283_v20 = vpop.permute.xlu1 %282 }
  0x91   : > { %391 = vrot.lane.b32.xlu0 %v1610_v9, %s1523_s24  ;;  %370 = vrot.lane.b32.xlu1 %v1610_v9, %s1524_s25  ;;  %v302_v21 = vpop.permute.xlu0 %301 }
  0x95   : > { %389 = vrot.lane.b32.xlu0 %v1607_v8, %s1523_s24  ;;  %368 = vrot.lane.b32.xlu1 %v1607_v8, %s1524_s25 }
  0x99   : > { %349 = vrot.lane.b32.xlu0 %v1610_v9, %s1525_s26  ;;  %324 = vrot.lane.b32.xlu1 %v1607_v8, %s1527_s28 }
  0x9d   : > { %347 = vrot.lane.b32.xlu0 %v1607_v8, %s1525_s26  ;;  %305 = vrot.lane.b32.xlu1 %v1610_v9, %s1526_s27 }
  0xa1   : > { %326 = vrot.lane.b32.xlu0 %v1610_v9, %s1527_s28  ;;  %284 = vrot.lane.b32.xlu1 %v1607_v8, %s1528_s29 }
  0xa5   : > { %303 = vrot.lane.b32.xlu0 %v1607_v8, %s1526_s27  ;;  %265 = vrot.lane.b32.xlu1 %v1610_v9, %s1529_s9 }
  0xa9   : > { %286 = vrot.lane.b32.xlu0 %v1610_v9, %s1528_s29  ;;  %445 = vperm.xlu1 %1511, %v442_v10  }
  0xad   : > { %263 = vrot.lane.b32.xlu0 %v1607_v8, %s1529_s9  ;;  %670 = vrot.lane.b32.xlu1 %v1521_v2, %s1523_s24 }
  0xb1   : > { %261 = vrot.lane.b32.xlu0 %v1521_v2, %s1529_s9  ;;  %630 = vrot.lane.b32.xlu1 %v1521_v2, %s1525_s26 }
  0xb5   : > { %529 = vperm.xlu0 %1510, %v1428_v11   ;;  %602 = vrot.lane.b32.xlu1 %v1521_v2, %s1527_s28  ;;  %v1432_v11 = vld [vmem:[%s2013_s1 + $0x10] sm:$0xff] }
  0xb9   : > { %688 = vrot.lane.b32.xlu0 %v1521_v2, %s1522_s4 }
  0xbd   : > { %650 = vrot.lane.b32.xlu0 %v1521_v2, %s1524_s25 }
  0xc1   : > { %582 = vrot.lane.b32.xlu0 %v1521_v2, %s1526_s27 }
  0xff   : > { %v411_v25 = vpop.permute.xlu0 %410  ;;  %v409_v26 = vpop.permute.xlu1 %408 }
 0x100   : > { %v416_v28 = vsel %vm414_vm2, %v411_v25, %v413_v12  ;;  %v415_v29 = vsel %vm414_vm2, %v409_v26, %v411_v25  ;;  %v1430_v12 = vld [vmem:[%s2015_s3 + $0x8] sm:$0xff] }
 0x101   : > { %1444 = vmatprep.subr.msk.mxu0 %vm1664_vm3, %v416_v28 }
 0x102   : > { %1445 = vmatpush1.msk.msra.mxu0 %vm1668_vm4, %v415_v29 }
 0x103   : > { %v392_v30 = vpop.permute.xlu0 %391  ;;  %v371_v31 = vpop.permute.xlu1 %370 }
 0x104   : > { %v397_v32 = vsel %vm395_vm5, %v392_v30, %v394_v13  ;;  %v376_v38 = vsel %vm374_vm6, %v371_v31, %v373_v18 }
 0x105   : > { %468 = vmatprep.subr.mxu0 %v397_v32 }
 0x107   : > { %v390_v33 = vpop.permute.xlu0 %389  ;;  %v369_v34 = vpop.permute.xlu1 %368 }
 0x108   : > { %v396_v36 = vsel %vm395_vm5, %v390_v33, %v392_v30  ;;  %v375_v39 = vsel %vm374_vm6, %v369_v34, %v371_v31 }
 0x109   : > { %469 = vmatpush1.msra.mxu0 %v396_v36 }
 0x10a   : > { %1446 = vmatprep.subr.msk.mxu0 %vm1679_vm7, %v376_v38 }
 0x10b   : > { %v350_v40 = vpop.permute.xlu0 %349  ;;  %1447 = vmatpush1.msk.msra.mxu0 %vm1684_vm8, %v375_v39  ;;  %v325_v42 = vpop.permute.xlu1 %324 }
 0x10c   : > { %v355_v41 = vsel %vm353_vm9, %v350_v40, %v352_v14  ;;  %v329_v48 = vsel %vm328_vm10, %v323_v17, %v325_v42 }
 0x10d   : > { %1448 = vmatprep.subr.msk.mxu0 %vm1664_vm3, %v355_v41 }
 0x10f   : > { %v348_v43 = vpop.permute.xlu0 %347  ;;  %v306_v45 = vpop.permute.xlu1 %305 }
 0x110   : > { %v354_v44 = vsel %vm353_vm9, %v348_v43, %v350_v40 }
 0x111   : > { %1449 = vmatpush1.msk.msra.mxu0 %vm1668_vm4, %v354_v44 }
 0x112   : > { %474 = vmatprep.subr.mxu0 %v1610_v9 }
 0x113   : > { %v327_v46 = vpop.permute.xlu0 %326  ;;  %475 = vmatpush1.msra.mxu0 %v1607_v8  ;;  %v285_v52 = vpop.permute.xlu1 %284 }
 0x114   : > { %v330_v47 = vsel %vm328_vm10, %v325_v42, %v327_v46  ;;  %v289_v55 = vsel %vm288_vm12, %v283_v20, %v285_v52 }
 0x115   : > { %1450 = vmatprep.subr.msk.mxu0 %vm1679_vm7, %v330_v47 }
 0x116   : > { %1451 = vmatpush1.msk.msra.mxu0 %vm1684_vm8, %v329_v48 }
 0x117   : > { %v304_v49 = vpop.permute.xlu0 %303  ;;  %v266_v56 = vpop.permute.xlu1 %265 }
 0x118   : > { %v308_v50 = vsel %vm307_vm11, %v302_v21, %v304_v49  ;;  %v309_v51 = vsel %vm307_vm11, %v304_v49, %v306_v45 }
 0x119   : > { %1452 = vmatprep.subr.msk.mxu0 %vm1664_vm3, %v309_v51 }
 0x11a   : > { %1453 = vmatpush1.msk.msra.mxu0 %vm1668_vm4, %v308_v50 }
 0x11b   : > { %v287_v53 = vpop.permute.xlu0 %286 }
 0x11c   : > { %v290_v54 = vsel %vm288_vm12, %v285_v52, %v287_v53 }
 0x11d   : > { %480 = vmatprep.subr.mxu0 %v290_v54 }
 0x11e   : > { %481 = vmatpush1.msra.mxu0 %v289_v55 }
 0x11f   : > { %v264_v57 = vpop.permute.xlu0 %263 }
 0x120   : > { %v269_v58 = vsel %vm267_vm13, %v264_v57, %v266_v56 }
 0x121   : > { %1454 = vmatprep.subr.msk.mxu0 %vm1679_vm7, %v269_v58 }
 0x123   : > { %v262_v59 = vpop.permute.xlu0 %261 }
 0x124   : > { %v268_v61 = vsel %vm267_vm13, %v262_v59, %v264_v57  ;;  %v446_v62 = vpop.permute.xlu1 %445  ;;  %v1429_v57 = vld [vmem:[%s2014_s2 + $0x8] sm:$0xff] }
 0x125   : > { %1455 = vmatpush1.msk.msra.mxu0 %vm1684_vm8, %v268_v61 }
 0x126   : > { %1427 = vmatmul.mubr.msk.f32.vlgmr.msra.gmra.mxu0 %vm448_vm14, %v423_v60 }
 0x127   : > { %1070 = vmatprep.mubr.f32.mxu0 %v1521_v2 }
 0x128   : > { %v671_v14 = vpop.permute.xlu1 %670 }
 0x12c   : > { %v631_v16 = vpop.permute.xlu1 %630 }
 0x130   : > { %v530_v1 = vpop.permute.xlu0 %529  ;;  %v603_v18 = vpop.permute.xlu1 %602 }
 0x134   : > { %v689_v13 = vpop.permute.xlu0 %688 }
 0x138   : > { %v651_v15 = vpop.permute.xlu0 %650 }
 0x13c   : > { %v583_v17 = vpop.permute.xlu0 %582 }
 0x1e6   : > { %v518_v63 = vpop.f32.mrf.mxu0 }
 0x1e7   : > { %v519_v0 = vadd.f32 %v518_v63, %v446_v62 }
 0x1e8   : > { %v520_v7 = vpop.f32.mrf.mxu0 }
 0x1e9   : > { %vm525_vm15 = vcmp.gt.f32.partialorder %v519_v0, 0.0  ;;  %v532_v5 = vmul.f32 %v530_v1, %v519_v0  ;;  %v521_v8 = vadd.f32 %v520_v7, %v446_v62 }
 0x1eb   : > { %v1727_v6 = vsel %vm525_vm15, %v519_v0, %v532_v5  ;;  %v533_v9 = vmul.f32 %v530_v1, %v521_v8  ;;  %vm526_vm0 = vcmp.gt.f32.partialorder %v521_v8, 0.0 }
 0x1ec   : > { %666 = vrot.lane.b32.xlu0 %v1727_v6, %s1523_s24  ;;  %684 = vrot.lane.b32.xlu1 %v1727_v6, %s1522_s4 }
 0x1ed   : > { %v535_v10 = vsel %vm526_vm0, %v521_v8, %v533_v9  ;;  %v1436_v9 = vld [vmem:[%s2013_s1 + $0x18] sm:$0xff] }
 0x1f0   : > { %626 = vrot.lane.b32.xlu0 %v1727_v6, %s1525_s26  ;;  %646 = vrot.lane.b32.xlu1 %v1727_v6, %s1524_s25 }
 0x1f4   : > { %584 = vrot.lane.b32.xlu0 %v1727_v6, %s1526_s27  ;;  %604 = vrot.lane.b32.xlu1 %v1727_v6, %s1527_s28 }
 0x1f8   : > { %668 = vrot.lane.b32.xlu0 %v535_v10, %s1523_s24  ;;  %566 = vrot.lane.b32.xlu1 %v1727_v6, %s1528_s29 }
 0x1fc   : > { %546 = vrot.lane.b32.xlu0 %v1727_v6, %s1529_s9  ;;  %686 = vrot.lane.b32.xlu1 %v535_v10, %s1522_s4 }
 0x200   : > { %628 = vrot.lane.b32.xlu0 %v535_v10, %s1525_s26  ;;  %648 = vrot.lane.b32.xlu1 %v535_v10, %s1524_s25 }
 0x204   : > { %606 = vrot.lane.b32.xlu0 %v535_v10, %s1527_s28  ;;  %564 = vrot.lane.b32.xlu1 %v1521_v2, %s1528_s29 }
 0x208   : > { %568 = vrot.lane.b32.xlu0 %v535_v10, %s1528_s29  ;;  %586 = vrot.lane.b32.xlu1 %v535_v10, %s1526_s27 }
 0x20c   : > { %544 = vrot.lane.b32.xlu0 %v1521_v2, %s1529_s9  ;;  %548 = vrot.lane.b32.xlu1 %v535_v10, %s1529_s9 }
 0x210   : > { %807 = vperm.xlu0 %1510, %v1432_v11   ;;  %722 = vperm.xlu1 %1511, %v1430_v12  }
 0x214   : > { %966 = vrot.lane.b32.xlu0 %v1521_v2, %s1522_s4  ;;  %948 = vrot.lane.b32.xlu1 %v1521_v2, %s1523_s24 }
 0x218   : > { %928 = vrot.lane.b32.xlu0 %v1521_v2, %s1524_s25  ;;  %908 = vrot.lane.b32.xlu1 %v1521_v2, %s1525_s26 }
 0x21c   : > { %860 = vrot.lane.b32.xlu0 %v1521_v2, %s1526_s27  ;;  %880 = vrot.lane.b32.xlu1 %v1521_v2, %s1527_s28 }
 0x25e   : > { %v667_v19 = vpop.permute.xlu0 %666  ;;  %v685_v20 = vpop.permute.xlu1 %684 }
 0x262   : > { %v627_v21 = vpop.permute.xlu0 %626  ;;  %v647_v22 = vpop.permute.xlu1 %646 }
 0x266   : > { %v585_v23 = vpop.permute.xlu0 %584  ;;  %v605_v25 = vpop.permute.xlu1 %604 }
 0x267   : > { %v608_v46 = vsel %vm328_vm10, %v603_v18, %v605_v25  ;;  %v588_v50 = vsel %vm307_vm11, %v583_v17, %v585_v23 }
 0x26a   : > { %v669_v26 = vpop.permute.xlu0 %668  ;;  %v567_v28 = vpop.permute.xlu1 %566 }
 0x26b   : > { %v673_v33 = vsel %vm395_vm5, %v669_v26, %v671_v14  ;;  %v672_v38 = vsel %vm395_vm5, %v667_v19, %v669_v26 }
 0x26e   : > { %v547_v29 = vpop.permute.xlu0 %546  ;;  %v687_v30 = vpop.permute.xlu1 %686 }
 0x26f   : > { %v691_v31 = vsel %vm414_vm2, %v687_v30, %v689_v13  ;;  %v690_v32 = vsel %vm414_vm2, %v685_v20, %v687_v30 }
 0x270   : > { %1456 = vmatprep.subr.msk.mxu1 %vm1664_vm3, %v691_v31 }
 0x271   : > { %1457 = vmatpush1.msk.msra.mxu1 %vm1668_vm4, %v690_v32 }
 0x272   : > { %v629_v34 = vpop.permute.xlu0 %628  ;;  %744 = vmatprep.subr.mxu1 %v673_v33  ;;  %v649_v36 = vpop.permute.xlu1 %648 }
 0x273   : > { %v652_v39 = vsel %vm374_vm6, %v647_v22, %v649_v36  ;;  %v653_v40 = vsel %vm374_vm6, %v649_v36, %v651_v15  ;;  %745 = vmatpush1.msra.mxu1 %v672_v38  ;;  %v633_v41 = vsel %vm353_vm9, %v629_v34, %v631_v16  ;;  %v632_v42 = vsel %vm353_vm9, %v627_v21, %v629_v34 }
 0x274   : > { %1458 = vmatprep.subr.msk.mxu1 %vm1679_vm7, %v653_v40 }
 0x275   : > { %1459 = vmatpush1.msk.msra.mxu1 %vm1684_vm8, %v652_v39 }
 0x276   : > { %v607_v43 = vpop.permute.xlu0 %606  ;;  %1460 = vmatprep.subr.msk.mxu1 %vm1664_vm3, %v633_v41  ;;  %v565_v44 = vpop.permute.xlu1 %564 }
 0x277   : > { %1461 = vmatpush1.msk.msra.mxu1 %vm1668_vm4, %v632_v42  ;;  %v609_v45 = vsel %vm328_vm10, %v605_v25, %v607_v43  ;;  %v570_v54 = vsel %vm288_vm12, %v565_v44, %v567_v28 }
 0x278   : > { %750 = vmatprep.subr.mxu1 %v535_v10  ;;  %v1434_v10 = vld [vmem:[%s2015_s3 + $0x10] sm:$0xff] }
 0x279   : > { %751 = vmatpush1.msra.mxu1 %v1727_v6 }
 0x27a   : > { %v569_v47 = vpop.permute.xlu0 %568  ;;  %1462 = vmatprep.subr.msk.mxu1 %vm1679_vm7, %v609_v45  ;;  %v587_v48 = vpop.permute.xlu1 %586 }
 0x27b   : > { %v589_v49 = vsel %vm307_vm11, %v585_v23, %v587_v48  ;;  %1463 = vmatpush1.msk.msra.mxu1 %vm1684_vm8, %v608_v46  ;;  %v571_v51 = vsel %vm288_vm12, %v567_v28, %v569_v47 }
 0x27c   : > { %1464 = vmatprep.subr.msk.mxu1 %vm1664_vm3, %v589_v49 }
 0x27d   : > { %1465 = vmatpush1.msk.msra.mxu1 %vm1668_vm4, %v588_v50 }
 0x27e   : > { %v545_v52 = vpop.permute.xlu0 %544  ;;  %756 = vmatprep.subr.mxu1 %v571_v51  ;;  %v549_v53 = vpop.permute.xlu1 %548 }
 0x27f   : > { %v550_v55 = vsel %vm267_vm13, %v545_v52, %v547_v29  ;;  %v551_v56 = vsel %vm267_vm13, %v547_v29, %v549_v53  ;;  %757 = vmatpush1.msra.mxu1 %v570_v54 }
 0x280   : > { %1466 = vmatprep.subr.msk.mxu1 %vm1679_vm7, %v551_v56 }
 0x281   : > { %1467 = vmatpush1.msk.msra.mxu1 %vm1684_vm8, %v550_v55  ;;  %v1433_v55 = vld [vmem:[%s2014_s2 + $0x10] sm:$0xff] }
 0x282   : > { %1431 = vmatmul.mubr.msk.f32.vlgmr.msra.gmra.mxu1 %vm448_vm14, %v1429_v57 }
 0x283   : > { %1346 = vmatprep.mubr.f32.mxu1 %v1521_v2 }
 0x28b   : > { %v723_v58 = vpop.permute.xlu1 %722  ;;  %v808_v62 = vpop.permute.xlu0 %807 }
 0x28f   : > { %v967_v11 = vpop.permute.xlu0 %966  ;;  %v949_v12 = vpop.permute.xlu1 %948 }
 0x293   : > { %v929_v13 = vpop.permute.xlu0 %928  ;;  %v909_v14 = vpop.permute.xlu1 %908 }
 0x297   : > { %v861_v15 = vpop.permute.xlu0 %860  ;;  %v881_v16 = vpop.permute.xlu1 %880 }
 0x342   : > { %v794_v59 = vpop.f32.mrf.mxu1 }
 0x343   : > { %v1821_v60 = vadd.f32 %v794_v59, %v723_v58 }
 0x344   : > { %v796_v63 = vpop.f32.mrf.mxu1 }
 0x345   : > { %v799_v61 = vadd.f32 %v1821_v60, %v1598_v3  ;;  %v1827_v5 = vadd.f32 %v796_v63, %v723_v58 }
 0x347   : > { %vm803_vm1 = vcmp.gt.f32.partialorder %v799_v61, 0.0  ;;  %v810_v0 = vmul.f32 %v808_v62, %v799_v61  ;;  %v800_v6 = vadd.f32 %v1827_v5, %v1600_v4 }
 0x349   : > { %v1825_v1 = vsel %vm803_vm1, %v799_v61, %v810_v0  ;;  %v811_v7 = vmul.f32 %v808_v62, %v800_v6  ;;  %vm804_vm15 = vcmp.gt.f32.partialorder %v800_v6, 0.0 }
 0x34a   : > { %944 = vrot.lane.b32.xlu0 %v1825_v1, %s1523_s24  ;;  %962 = vrot.lane.b32.xlu1 %v1825_v1, %s1522_s4 }
 0x34b   : > { %v813_v8 = vsel %vm804_vm15, %v800_v6, %v811_v7  ;;  %v1438_v7 = vld [vmem:[%s2015_s3 + $0x18] sm:$0xff] }
 0x34e   : > { %904 = vrot.lane.b32.xlu0 %v1825_v1, %s1525_s26  ;;  %924 = vrot.lane.b32.xlu1 %v1825_v1, %s1524_s25 }
 0x352   : > { %862 = vrot.lane.b32.xlu0 %v1825_v1, %s1526_s27  ;;  %882 = vrot.lane.b32.xlu1 %v1825_v1, %s1527_s28 }
 0x356   : > { %946 = vrot.lane.b32.xlu0 %v813_v8, %s1523_s24  ;;  %844 = vrot.lane.b32.xlu1 %v1825_v1, %s1528_s29 }
 0x35a   : > { %824 = vrot.lane.b32.xlu0 %v1825_v1, %s1529_s9  ;;  %964 = vrot.lane.b32.xlu1 %v813_v8, %s1522_s4 }
 0x35e   : > { %906 = vrot.lane.b32.xlu0 %v813_v8, %s1525_s26  ;;  %926 = vrot.lane.b32.xlu1 %v813_v8, %s1524_s25 }
 0x362   : > { %884 = vrot.lane.b32.xlu0 %v813_v8, %s1527_s28  ;;  %842 = vrot.lane.b32.xlu1 %v1521_v2, %s1528_s29 }
 0x366   : > { %846 = vrot.lane.b32.xlu0 %v813_v8, %s1528_s29  ;;  %864 = vrot.lane.b32.xlu1 %v813_v8, %s1526_s27 }
 0x36a   : > { %822 = vrot.lane.b32.xlu0 %v1521_v2, %s1529_s9  ;;  %826 = vrot.lane.b32.xlu1 %v813_v8, %s1529_s9 }
 0x36e   : > { %1083 = vperm.xlu0 %1510, %v1436_v9   ;;  %1000 = vperm.xlu1 %1511, %v1434_v10  }
 0x372   : > { %1242 = vrot.lane.b32.xlu0 %v1521_v2, %s1522_s4  ;;  %1224 = vrot.lane.b32.xlu1 %v1521_v2, %s1523_s24 }
 0x376   : > { %1204 = vrot.lane.b32.xlu0 %v1521_v2, %s1524_s25  ;;  %1184 = vrot.lane.b32.xlu1 %v1521_v2, %s1525_s26 }
 0x37a   : > { %1136 = vrot.lane.b32.xlu0 %v1521_v2, %s1526_s27  ;;  %1156 = vrot.lane.b32.xlu1 %v1521_v2, %s1527_s28 }
 0x3bc   : > { %v945_v17 = vpop.permute.xlu0 %944  ;;  %v963_v18 = vpop.permute.xlu1 %962 }
 0x3c0   : > { %v905_v19 = vpop.permute.xlu0 %904  ;;  %v925_v20 = vpop.permute.xlu1 %924 }
 0x3c4   : > { %v863_v21 = vpop.permute.xlu0 %862  ;;  %v883_v22 = vpop.permute.xlu1 %882 }
 0x3c5   : > { %v886_v44 = vsel %vm328_vm10, %v881_v16, %v883_v22  ;;  %v866_v48 = vsel %vm307_vm11, %v861_v15, %v863_v21 }
 0x3c8   : > { %v947_v23 = vpop.permute.xlu0 %946  ;;  %v845_v25 = vpop.permute.xlu1 %844 }
 0x3c9   : > { %v951_v31 = vsel %vm395_vm5, %v947_v23, %v949_v12  ;;  %v950_v32 = vsel %vm395_vm5, %v945_v17, %v947_v23 }
 0x3cc   : > { %v825_v26 = vpop.permute.xlu0 %824  ;;  %v965_v28 = vpop.permute.xlu1 %964 }
 0x3cd   : > { %v968_v29 = vsel %vm414_vm2, %v963_v18, %v965_v28  ;;  %v969_v30 = vsel %vm414_vm2, %v965_v28, %v967_v11 }
 0x3ce   : > { %1468 = vmatprep.subr.msk.mxu0 %vm1664_vm3, %v969_v30 }
 0x3cf   : > { %1469 = vmatpush1.msk.msra.mxu0 %vm1668_vm4, %v968_v29 }
 0x3d0   : > { %v907_v33 = vpop.permute.xlu0 %906  ;;  %1022 = vmatprep.subr.mxu0 %v951_v31  ;;  %v927_v34 = vpop.permute.xlu1 %926 }
 0x3d1   : > { %v930_v36 = vsel %vm374_vm6, %v925_v20, %v927_v34  ;;  %v931_v38 = vsel %vm374_vm6, %v927_v34, %v929_v13  ;;  %1023 = vmatpush1.msra.mxu0 %v950_v32  ;;  %v911_v39 = vsel %vm353_vm9, %v907_v33, %v909_v14  ;;  %v910_v40 = vsel %vm353_vm9, %v905_v19, %v907_v33 }
 0x3d2   : > { %1470 = vmatprep.subr.msk.mxu0 %vm1679_vm7, %v931_v38 }
 0x3d3   : > { %1471 = vmatpush1.msk.msra.mxu0 %vm1684_vm8, %v930_v36 }
 0x3d4   : > { %v885_v41 = vpop.permute.xlu0 %884  ;;  %1472 = vmatprep.subr.msk.mxu0 %vm1664_vm3, %v911_v39  ;;  %v843_v42 = vpop.permute.xlu1 %842 }
 0x3d5   : > { %1473 = vmatpush1.msk.msra.mxu0 %vm1668_vm4, %v910_v40  ;;  %v887_v43 = vsel %vm328_vm10, %v883_v22, %v885_v41  ;;  %v848_v50 = vsel %vm288_vm12, %v843_v42, %v845_v25 }
 0x3d6   : > { %1028 = vmatprep.subr.mxu0 %v813_v8 }
 0x3d7   : > { %1029 = vmatpush1.msra.mxu0 %v1825_v1 }
 0x3d8   : > { %v847_v45 = vpop.permute.xlu0 %846  ;;  %1474 = vmatprep.subr.msk.mxu0 %vm1679_vm7, %v887_v43  ;;  %v865_v46 = vpop.permute.xlu1 %864 }
 0x3d9   : > { %v867_v47 = vsel %vm307_vm11, %v863_v21, %v865_v46  ;;  %1475 = vmatpush1.msk.msra.mxu0 %vm1684_vm8, %v886_v44  ;;  %v849_v49 = vsel %vm288_vm12, %v845_v25, %v847_v45 }
 0x3da   : > { %1476 = vmatprep.subr.msk.mxu0 %vm1664_vm3, %v867_v47 }
 0x3db   : > { %1477 = vmatpush1.msk.msra.mxu0 %vm1668_vm4, %v866_v48 }
 0x3dc   : > { %v823_v51 = vpop.permute.xlu0 %822  ;;  %1034 = vmatprep.subr.mxu0 %v849_v49  ;;  %v827_v52 = vpop.permute.xlu1 %826 }
 0x3dd   : > { %v828_v53 = vsel %vm267_vm13, %v823_v51, %v825_v26  ;;  %v829_v54 = vsel %vm267_vm13, %v825_v26, %v827_v52  ;;  %1035 = vmatpush1.msra.mxu0 %v848_v50 }
 0x3de   : > { %1478 = vmatprep.subr.msk.mxu0 %vm1679_vm7, %v829_v54 }
 0x3df   : > { %1479 = vmatpush1.msk.msra.mxu0 %vm1684_vm8, %v828_v53 }
 0x3e0   : > { %1435 = vmatmul.mubr.msk.f32.vlgmr.msra.gmra.mxu0 %vm448_vm14, %v1433_v55 }
 0x3e9   : > { %v1001_v56 = vpop.permute.xlu1 %1000  ;;  %v1084_v59 = vpop.permute.xlu0 %1083 }
 0x3ed   : > { %v1243_v8 = vpop.permute.xlu0 %1242  ;;  %v1225_v9 = vpop.permute.xlu1 %1224 }
 0x3f1   : > { %v1205_v10 = vpop.permute.xlu0 %1204  ;;  %v1185_v11 = vpop.permute.xlu1 %1184 }
 0x3f5   : > { %v1137_v12 = vpop.permute.xlu0 %1136  ;;  %v1157_v13 = vpop.permute.xlu1 %1156 }
 0x4a0   : > { %v1072_v57 = vpop.f32.mrf.mxu0 }
 0x4a1   : > { %v1073_v58 = vadd.f32 %v1072_v57, %v1001_v56 }
 0x4a2   : > { %v1074_v63 = vpop.f32.mrf.mxu0 }
 0x4a3   : > { %vm1079_vm0 = vcmp.gt.f32.partialorder %v1073_v58, 0.0  ;;  %v1086_v61 = vmul.f32 %v1084_v59, %v1073_v58  ;;  %v1075_v0 = vadd.f32 %v1074_v63, %v1001_v56 }
 0x4a5   : > { %v1922_v62 = vsel %vm1079_vm0, %v1073_v58, %v1086_v61  ;;  %v1087_v1 = vmul.f32 %v1084_v59, %v1075_v0  ;;  %vm1080_vm1 = vcmp.gt.f32.partialorder %v1075_v0, 0.0 }
 0x4a6   : > { %1220 = vrot.lane.b32.xlu0 %v1922_v62, %s1523_s24  ;;  %1238 = vrot.lane.b32.xlu1 %v1922_v62, %s1522_s4 }
 0x4a7   : > { %v1089_v6 = vsel %vm1080_vm1, %v1075_v0, %v1087_v1 }
 0x4aa   : > { %1180 = vrot.lane.b32.xlu0 %v1922_v62, %s1525_s26  ;;  %1200 = vrot.lane.b32.xlu1 %v1922_v62, %s1524_s25 }
 0x4ae   : > { %1138 = vrot.lane.b32.xlu0 %v1922_v62, %s1526_s27  ;;  %1158 = vrot.lane.b32.xlu1 %v1922_v62, %s1527_s28 }
 0x4b2   : > { %1222 = vrot.lane.b32.xlu0 %v1089_v6, %s1523_s24  ;;  %1120 = vrot.lane.b32.xlu1 %v1922_v62, %s1528_s29 }
 0x4b6   : > { %1100 = vrot.lane.b32.xlu0 %v1922_v62, %s1529_s9  ;;  %1240 = vrot.lane.b32.xlu1 %v1089_v6, %s1522_s4 }
 0x4ba   : > { %1182 = vrot.lane.b32.xlu0 %v1089_v6, %s1525_s26  ;;  %1202 = vrot.lane.b32.xlu1 %v1089_v6, %s1524_s25 }
 0x4be   : > { %1160 = vrot.lane.b32.xlu0 %v1089_v6, %s1527_s28  ;;  %1118 = vrot.lane.b32.xlu1 %v1521_v2, %s1528_s29 }
 0x4c2   : > { %1122 = vrot.lane.b32.xlu0 %v1089_v6, %s1528_s29  ;;  %1140 = vrot.lane.b32.xlu1 %v1089_v6, %s1526_s27  ;;  %s1353_s27 = sld [smem:[#allocation4]] }
 0x4c6   : > { %1098 = vrot.lane.b32.xlu0 %v1521_v2, %s1529_s9  ;;  %1102 = vrot.lane.b32.xlu1 %v1089_v6, %s1529_s9  ;;  %s225_s9 = scalar_lea.vmem %s2017_s5, %s1442_s30 }
 0x4c8   : > { %v1356_v53 = vstv %s1353_s27 }
 0x4ca   : > { %1276 = vperm.xlu1 %1511, %v1438_v7  }
 0x518   : > { %v1221_v14 = vpop.permute.xlu0 %1220  ;;  %v1239_v15 = vpop.permute.xlu1 %1238 }
 0x51c   : > { %v1181_v16 = vpop.permute.xlu0 %1180  ;;  %v1201_v17 = vpop.permute.xlu1 %1200 }
 0x520   : > { %v1139_v18 = vpop.permute.xlu0 %1138  ;;  %v1159_v19 = vpop.permute.xlu1 %1158 }
 0x521   : > { %v1162_v40 = vsel %vm328_vm10, %v1157_v13, %v1159_v19  ;;  %v1142_v44 = vsel %vm307_vm11, %v1137_v12, %v1139_v18 }
 0x524   : > { %v1223_v2 = vpop.permute.xlu0 %1222  ;;  %v1121_v20 = vpop.permute.xlu1 %1120 }
 0x525   : > { %v1227_v26 = vsel %vm395_vm5, %v1223_v2, %v1225_v9  ;;  %v1226_v28 = vsel %vm395_vm5, %v1221_v14, %v1223_v2 }
 0x528   : > { %v1101_v21 = vpop.permute.xlu0 %1100  ;;  %v1241_v22 = vpop.permute.xlu1 %1240 }
 0x529   : > { %v1244_v23 = vsel %vm414_vm2, %v1239_v15, %v1241_v22  ;;  %v1245_v25 = vsel %vm414_vm2, %v1241_v22, %v1243_v8 }
 0x52a   : > { %1480 = vmatprep.subr.msk.mxu1 %vm1664_vm3, %v1245_v25 }
 0x52b   : > { %1481 = vmatpush1.msk.msra.mxu1 %vm1668_vm4, %v1244_v23 }
 0x52c   : > { %v1183_v29 = vpop.permute.xlu0 %1182  ;;  %1298 = vmatprep.subr.mxu1 %v1227_v26  ;;  %v1203_v30 = vpop.permute.xlu1 %1202 }
 0x52d   : > { %v1206_v31 = vsel %vm374_vm6, %v1201_v17, %v1203_v30  ;;  %v1207_v32 = vsel %vm374_vm6, %v1203_v30, %v1205_v10  ;;  %1299 = vmatpush1.msra.mxu1 %v1226_v28  ;;  %v1187_v33 = vsel %vm353_vm9, %v1183_v29, %v1185_v11  ;;  %v1186_v34 = vsel %vm353_vm9, %v1181_v16, %v1183_v29 }
 0x52e   : > { %1482 = vmatprep.subr.msk.mxu1 %vm1679_vm7, %v1207_v32 }
 0x52f   : > { %1483 = vmatpush1.msk.msra.mxu1 %vm1684_vm8, %v1206_v31 }
 0x530   : > { %v1161_v36 = vpop.permute.xlu0 %1160  ;;  %1484 = vmatprep.subr.msk.mxu1 %vm1664_vm3, %v1187_v33  ;;  %v1119_v38 = vpop.permute.xlu1 %1118 }
 0x531   : > { %1485 = vmatpush1.msk.msra.mxu1 %vm1668_vm4, %v1186_v34  ;;  %v1163_v39 = vsel %vm328_vm10, %v1159_v19, %v1161_v36  ;;  %v1124_v46 = vsel %vm288_vm12, %v1119_v38, %v1121_v20 }
 0x532   : > { %1304 = vmatprep.subr.mxu1 %v1089_v6 }
 0x533   : > { %1305 = vmatpush1.msra.mxu1 %v1922_v62 }
 0x534   : > { %v1123_v41 = vpop.permute.xlu0 %1122  ;;  %1486 = vmatprep.subr.msk.mxu1 %vm1679_vm7, %v1163_v39  ;;  %v1141_v42 = vpop.permute.xlu1 %1140 }
 0x535   : > { %v1143_v43 = vsel %vm307_vm11, %v1139_v18, %v1141_v42  ;;  %1487 = vmatpush1.msk.msra.mxu1 %vm1684_vm8, %v1162_v40  ;;  %v1125_v45 = vsel %vm288_vm12, %v1121_v20, %v1123_v41 }
 0x536   : > { %1488 = vmatprep.subr.msk.mxu1 %vm1664_vm3, %v1143_v43 }
 0x537   : > { %1489 = vmatpush1.msk.msra.mxu1 %vm1668_vm4, %v1142_v44 }
 0x538   : > { %v1099_v47 = vpop.permute.xlu0 %1098  ;;  %1310 = vmatprep.subr.mxu1 %v1125_v45  ;;  %v1103_v48 = vpop.permute.xlu1 %1102 }
 0x539   : > { %v1104_v49 = vsel %vm267_vm13, %v1099_v47, %v1101_v21  ;;  %v1105_v50 = vsel %vm267_vm13, %v1101_v21, %v1103_v48  ;;  %1311 = vmatpush1.msra.mxu1 %v1124_v46 }
 0x53a   : > { %1490 = vmatprep.subr.msk.mxu1 %vm1679_vm7, %v1105_v50 }
 0x53b   : > { %1491 = vmatpush1.msk.msra.mxu1 %vm1684_vm8, %v1104_v49 }
 0x53c   : > { %1439 = vmatmul.mubr.msk.f32.vlgmr.msra.gmra.mxu1 %vm448_vm14, %v1437_v24 }
 0x545   : > { %v1277_v27 = vpop.permute.xlu1 %1276 }
 0x5fc   : > { %v1348_v51 = vpop.f32.mrf.mxu1 }
 0x5fd   : > { %v1349_v52 = vadd.f32 %v1348_v51, %v1277_v27 }
 0x5fe   : > { %v1350_v54 = vpop.f32.mrf.mxu1 }
 0x5ff   : > { %v1354_v55 = vadd.f32 %v1349_v52, %v1821_v60  ;;  %v1351_v56 = vadd.f32 %v1350_v54, %v1277_v27 }
 0x601   : > { %v1357_v57 = vmul.f32 %v1356_v53, %v1354_v55  ;;  %v1355_v58 = vadd.f32 %v1351_v56, %v1827_v5 }
 0x603   : > { %v1359_v35 = vadd.f32 %v1357_v57, %v1598_v3  ;;  %v1358_v37 = vmul.f32 %v1356_v53, %v1355_v58 }
 0x605   : > { %1361 = vst [vmem:[%s225_s9] sm:$0xff] %v1359_v35  ;;  %v1360_v59 = vadd.f32 %v1358_v37, %v1600_v4 }
 0x607   : > { %1362 = vst [vmem:[%s225_s9 + $0x8] sm:$0xff] %v1360_v59 }
 0x608 PF: > { %s16_s20 = sadd.s32 1, %s1518_s20  }
 0x609   : > { %p13_p4 = scmp.ge.s32.totalorder %s16_s20, 4  }
 0x60b   :  { %15 = sbr.rel (!%p13_p4) target bundleno = 2 (0x2), region = 79 }

</bundles_post_ra>
